<compile_context>
chip_gen: v7x
topology: tpu7x:2x2x1
jax: 0.10.0
libtpu: 0.0.40
codegen_flags: <defaults>
</compile_context>

<pallas_src>
import functools

import jax
import jax.numpy as jnp
from jax.experimental import pallas as pl
from jax.experimental.pallas import tpu as pltpu


def _round_up(x, m):
    return ((x + m - 1) // m) * m


# ----------------------------- Kernel 1: MLP over context ---------------------------- #

def _mlp_kernel(ctx_ref, *refs):
    """v = Linear(ReLU(... Linear(ctx))) for one Nc tile. refs = (w1, b1, ..., wL, bL, v_out)."""
    v_ref = refs[-1]
    wb = refs[:-1]
    n_layers = len(wb) // 2
    h = ctx_ref[...]
    for l in range(n_layers):
        w = wb[2 * l][...]
        b = wb[2 * l + 1][...]
        h = jnp.dot(h, w, preferred_element_type=jnp.float32) + b
        if l < n_layers - 1:
            h = jnp.maximum(h, 0.0)
    v_ref[...] = h.astype(v_ref.dtype)


def _run_mlp(context_pad, params, nc_tile, dout):
    nc_pad, din = context_pad.shape
    in_specs = [pl.BlockSpec((nc_tile, din), lambda i: (i, 0))]
    wb_flat = []
    for (w, b) in params:
        wb_flat += [w, b]
        # Full-array blocks with constant index maps: fetched once, stay VMEM-resident.
        in_specs += [pl.BlockSpec(w.shape, lambda i: (0, 0)),
                     pl.BlockSpec(b.shape, lambda i: (0, 0))]
    return pl.pallas_call(
        _mlp_kernel,
        out_shape=jax.ShapeDtypeStruct((nc_pad, dout), jnp.float32),
        grid=(nc_pad // nc_tile,),
        in_specs=in_specs,
        out_specs=pl.BlockSpec((nc_tile, dout), lambda i: (i, 0)),
        compiler_params=pltpu.CompilerParams(
            dimension_semantics=("parallel",),
            vmem_limit_bytes=32 * 1024 * 1024),
    )(context_pad, *wb_flat)


# --------------------- Kernel 2: Laplace attention (tiled reduction) ------------------ #

def _laplace_attn_kernel(k_ref, q_ref, v_ref, out_ref, acc_ref, *,
                         neg_inv_scale, compute_dtype, dout):
    j = pl.program_id(1)                         # Nc reduction step (innermost axis)

    @pl.when(j == 0)
    def _init():
        acc_ref[...] = jnp.zeros_like(acc_ref)

    # Transposed Laplace weights: wT[c, t] = exp(-|k[c] - q[t]| / scale).
    # |k - q| is formed in f32 (exact positions); the dominant exp runs in
    # compute_dtype (bf16 EUP on v6e/v7x when requested).
    diff = jnp.abs(k_ref[...] - q_ref[...]) * neg_inv_scale          # [nc_t, nt_t] f32
    w_t = jnp.exp(diff.astype(compute_dtype))                        # [nc_t, nt_t]

    v_blk = v_ref[...].astype(compute_dtype)                         # [nc_t, dout]
    # r^T[d, t] = sum_c v[c, d] * wT[c, t]: VPU multiply + sublane reduce (no MXU
    # matmul with a 1-column RHS).  Accumulate in f32.
    parts = [
        jnp.sum((w_t * v_blk[:, d:d + 1]).astype(jnp.float32), axis=0, keepdims=True)
        for d in range(dout)
    ]
    acc_ref[...] += parts[0] if dout == 1 else jnp.concatenate(parts, axis=0)

    @pl.when(j == pl.num_programs(1) - 1)
    def _finalize():
        out_ref[...] = acc_ref[...].astype(out_ref.dtype)


def _run_attention(k_col, q_row, v, nt_tile, nc_tile, neg_inv_scale, compute_dtype, dout):
    nc_pad = k_col.shape[0]
    nt_pad = q_row.shape[1]
    kernel = functools.partial(_laplace_attn_kernel,
                               neg_inv_scale=neg_inv_scale,
                               compute_dtype=compute_dtype,
                               dout=dout)
    return pl.pallas_call(
        kernel,
        out_shape=jax.ShapeDtypeStruct((dout, nt_pad), jnp.float32),
        grid=(nt_pad // nt_tile, nc_pad // nc_tile),
        in_specs=[
            pl.BlockSpec((nc_tile, 1), lambda i, j: (j, 0)),         # context keys
            pl.BlockSpec((1, nt_tile), lambda i, j: (0, i)),         # target queries
            pl.BlockSpec((nc_tile, dout), lambda i, j: (j, 0)),      # v = MLP(context)
        ],
        out_specs=pl.BlockSpec((dout, nt_tile), lambda i, j: (0, i)),
        scratch_shapes=[pltpu.VMEM((dout, nt_tile), jnp.float32)],
        compiler_params=pltpu.CompilerParams(
            dimension_semantics=("parallel", "arbitrary"),
            vmem_limit_bytes=32 * 1024 * 1024),
    )(k_col, q_row, v)


# --------------------------------- Forward wrapper ----------------------------------- #

def deterministic_encoder_forward(x_context, y_context, x_target, params, *,
                                  scale=1.0, nt_tile=256, nc_tile=256,
                                  compute_dtype=jnp.float32):
    """DeterministicEncoder forward = MLP kernel + tiled Laplace-attention kernel."""
    assert x_context.shape[1] == 1 and x_target.shape[1] == 1, (
        "reference laplace() flattens keys/queries; only x_dim == 1 is supported")
    nc = x_context.shape[0]
    nt = x_target.shape[0]
    dout = params[-1][0].shape[1]

    # Effective tiles: shrink for small problems, keep (8, 128) alignment.
    nc_tile = min(nc_tile, _round_up(nc, 8))
    nt_tile = min(nt_tile, _round_up(nt, 128))
    nc_pad = _round_up(nc, nc_tile)
    nt_pad = _round_up(nt, nt_tile)

    context = jnp.concatenate([x_context, y_context], axis=-1)           # [Nc, Din]
    context = jnp.pad(context, ((0, nc_pad - nc), (0, 0)))
    # Padded keys get +1e30 so their Laplace weight is exactly 0.
    k_col = jnp.pad(x_context[:, 0], (0, nc_pad - nc),
                    constant_values=1e30)[:, None]                       # [Nc_pad, 1]
    q_row = jnp.pad(x_target[:, 0], (0, nt_pad - nt))[None, :]           # [1, Nt_pad]

    v = _run_mlp(context, params, nc_tile, dout)                         # [Nc_pad, Dout]
    r_t = _run_attention(k_col, q_row, v, nt_tile, nc_tile,
                         -1.0 / scale, compute_dtype, dout)              # [Dout, Nt_pad]
    return r_t[:, :nt].T                                                 # [Nt, Dout]


# --------------------------------- Reference & demo ---------------------------------- #

def init_linear(key, fan_in, fan_out):
    """PyTorch-style nn.Linear init (uniform +-1/sqrt(fan_in)), stored as [in, out]."""
    kw, kb = jax.random.split(key)
    bound = 1.0 / (fan_in ** 0.5)
    w = jax.random.uniform(kw, (fan_in, fan_out), jnp.float32, -bound, bound)
    b = jax.random.uniform(kb, (1, fan_out), jnp.float32, -bound, bound)
    return w, b


def jax_reference(x_context, y_context, x_target, params, scale=1.0):
    hp = jax.lax.Precision.HIGHEST
    h = jnp.concatenate([x_context, y_context], axis=-1)
    for idx, (w, b) in enumerate(params):
        h = jnp.dot(h, w, precision=hp) + b
        if idx < len(params) - 1:
            h = jnp.maximum(h, 0.0)
    k = x_context[:, 0][None, :]                 # [1, Nc]
    q = x_target[:, 0][:, None]                  # [Nt, 1]
    weights = jnp.exp(-jnp.abs(k - q) / scale)
    return jnp.dot(weights, h, precision=hp)


if __name__ == "__main__":
    # DeterministicEncoder(input_size=2, output_size=1, hidden_size=[16, 16]);
    # input_size must equal x_dim + y_dim, and laplace() requires x_dim == 1.
    hidden = [16, 16]
    x_dim, y_dim, out_dim = 1, 1, 1
    in_dim = x_dim + y_dim
    # Non-tile-multiples -> exercises key padding (Nc), target padding (Nt), a
    # multi-step "arbitrary" reduction over Nc and a multi-tile "parallel" Nt axis.
    num_context, num_target = 264, 384

    key = jax.random.PRNGKey(0)
    k_xc, k_yc, k_xt, kp = jax.random.split(key, 4)
    x_context = jax.random.normal(k_xc, (num_context, x_dim), jnp.float32)
    y_context = jax.random.normal(k_yc, (num_context, y_dim), jnp.float32)
    x_target = jax.random.normal(k_xt, (num_target, x_dim), jnp.float32)

    dims = [in_dim] + hidden + [out_dim]
    pkeys = jax.random.split(kp, len(dims) - 1)
    params = tuple(init_linear(pkeys[i], dims[i], dims[i + 1]) for i in range(len(dims) - 1))

    ref = jax_reference(x_context, y_context, x_target, params)

    # float32 compute path (safe on all chips, incl. v5e).
    out = deterministic_encoder_forward(x_context, y_context, x_target, params,
                                        compute_dtype=jnp.float32)
    out = jax.block_until_ready(out)
    assert out.shape == (num_target, out_dim)
    assert jnp.allclose(out, ref, atol=1e-4, rtol=1e-4), "f32 kernel mismatch vs reference"

    # bf16 exp/multiply path (recommended on v6e/v7x; keep f32 on v5e) — loose check.
    out_bf16 = deterministic_encoder_forward(x_context, y_context, x_target, params,
                                             compute_dtype=jnp.bfloat16)
    out_bf16 = jax.block_until_ready(out_bf16)
    rel = jnp.max(jnp.abs(out_bf16 - ref)) / (jnp.max(jnp.abs(ref)) + 1e-6)
    assert rel < 0.1, f"bf16 kernel too far from reference: {rel}"

    print("KERNEL_OK")
</pallas_src>

<mosaic_0001>
module attributes {stable_mosaic.version = 11 : i64} {
  func.func @_mlp_kernel(%arg0: i32, %arg1: memref<256x2xf32, #tpu.memory_space<vmem>>, %arg2: memref<2x16xf32, #tpu.memory_space<vmem>>, %arg3: memref<1x16xf32, #tpu.memory_space<vmem>>, %arg4: memref<16x16xf32, #tpu.memory_space<vmem>>, %arg5: memref<1x16xf32, #tpu.memory_space<vmem>>, %arg6: memref<16x1xf32, #tpu.memory_space<vmem>>, %arg7: memref<1x1xf32, #tpu.memory_space<vmem>>, %arg8: memref<256x1xf32, #tpu.memory_space<vmem>>) attributes {dimension_semantics = [#tpu.dimension_semantics<parallel>], iteration_bounds = array<i64: 2>, scalar_prefetch = 0 : i64, scratch_operands = 0 : i64, tpu.core_type = #tpu.core_type<tc>, window_params = [{transform_indices = @transform_0, window_bounds = array<i64: 256, 2>}, {pipeline_mode = #tpu.pipeline_mode<synchronous>, transform_indices = @transform_1, window_bounds = array<i64: 2, 16>}, {pipeline_mode = #tpu.pipeline_mode<synchronous>, transform_indices = @transform_2, window_bounds = array<i64: 1, 16>}, {pipeline_mode = #tpu.pipeline_mode<synchronous>, transform_indices = @transform_3, window_bounds = array<i64: 16, 16>}, {pipeline_mode = #tpu.pipeline_mode<synchronous>, transform_indices = @transform_4, window_bounds = array<i64: 1, 16>}, {pipeline_mode = #tpu.pipeline_mode<synchronous>, transform_indices = @transform_5, window_bounds = array<i64: 16, 1>}, {pipeline_mode = #tpu.pipeline_mode<synchronous>, transform_indices = @transform_6, window_bounds = array<i64: 1, 1>}, {transform_indices = @transform_7, window_bounds = array<i64: 256, 1>}]} {
    %c0 = arith.constant 0 : index
    %c0_0 = arith.constant 0 : index
    %0 = vector.load %arg1[%c0, %c0_0] : memref<256x2xf32, #tpu.memory_space<vmem>>, vector<256x2xf32>
    %c0_1 = arith.constant 0 : index
    %c0_2 = arith.constant 0 : index
    %1 = vector.load %arg2[%c0_1, %c0_2] : memref<2x16xf32, #tpu.memory_space<vmem>>, vector<2x16xf32>
    %c0_3 = arith.constant 0 : index
    %c0_4 = arith.constant 0 : index
    %2 = vector.load %arg3[%c0_3, %c0_4] : memref<1x16xf32, #tpu.memory_space<vmem>>, vector<1x16xf32>
    %cst = arith.constant dense<0.000000e+00> : vector<256x16xf32>
    %3 = tpu.matmul %0, %1, %cst {dimension_numbers = #tpu.dot_dimension_numbers<[1], [0], [0], [1], [0, 0, 1, 1], [], []>} : vector<256x2xf32>, vector<2x16xf32>, vector<256x16xf32> -> vector<256x16xf32>
    %4 = vector.broadcast %2 : vector<1x16xf32> to vector<256x16xf32>
    %5 = arith.addf %3, %4 : vector<256x16xf32>
    %cst_5 = arith.constant 0.000000e+00 : f32
    %6 = vector.broadcast %cst_5 : f32 to vector<256x16xf32>
    %7 = arith.maximumf %5, %6 : vector<256x16xf32>
    %c0_6 = arith.constant 0 : index
    %c0_7 = arith.constant 0 : index
    %8 = vector.load %arg4[%c0_6, %c0_7] : memref<16x16xf32, #tpu.memory_space<vmem>>, vector<16x16xf32>
    %c0_8 = arith.constant 0 : index
    %c0_9 = arith.constant 0 : index
    %9 = vector.load %arg5[%c0_8, %c0_9] : memref<1x16xf32, #tpu.memory_space<vmem>>, vector<1x16xf32>
    %cst_10 = arith.constant dense<0.000000e+00> : vector<256x16xf32>
    %10 = tpu.matmul %7, %8, %cst_10 {dimension_numbers = #tpu.dot_dimension_numbers<[1], [0], [0], [1], [0, 0, 1, 1], [], []>} : vector<256x16xf32>, vector<16x16xf32>, vector<256x16xf32> -> vector<256x16xf32>
    %11 = vector.broadcast %9 : vector<1x16xf32> to vector<256x16xf32>
    %12 = arith.addf %10, %11 : vector<256x16xf32>
    %cst_11 = arith.constant 0.000000e+00 : f32
    %13 = vector.broadcast %cst_11 : f32 to vector<256x16xf32>
    %14 = arith.maximumf %12, %13 : vector<256x16xf32>
    %c0_12 = arith.constant 0 : index
    %c0_13 = arith.constant 0 : index
    %15 = vector.load %arg6[%c0_12, %c0_13] : memref<16x1xf32, #tpu.memory_space<vmem>>, vector<16x1xf32>
    %c0_14 = arith.constant 0 : index
    %c0_15 = arith.constant 0 : index
    %16 = vector.load %arg7[%c0_14, %c0_15] : memref<1x1xf32, #tpu.memory_space<vmem>>, vector<1x1xf32>
    %cst_16 = arith.constant dense<0.000000e+00> : vector<256x1xf32>
    %17 = tpu.matmul %14, %15, %cst_16 {dimension_numbers = #tpu.dot_dimension_numbers<[1], [0], [0], [1], [0, 0, 1, 1], [], []>} : vector<256x16xf32>, vector<16x1xf32>, vector<256x1xf32> -> vector<256x1xf32>
    %18 = vector.broadcast %16 : vector<1x1xf32> to vector<256x1xf32>
    %19 = arith.addf %17, %18 : vector<256x1xf32>
    %c0_17 = arith.constant 0 : index
    %c0_18 = arith.constant 0 : index
    %20 = vector.load %arg8[%c0_17, %c0_18] : memref<256x1xf32, #tpu.memory_space<vmem>>, vector<256x1xf32>
    tpu.vector_store %arg8[%c0_17, %c0_18], %19 {strides = array<i32>} : memref<256x1xf32, #tpu.memory_space<vmem>>, vector<256x1xf32>,
    return
  }
  func.func @transform_0(%arg0: i32) -> (i32, i32) {
    %c0_i32 = arith.constant 0 : i32
    %c0_i32_0 = arith.constant 0 : i32
    return %arg0, %c0_i32 : i32, i32
  }
  func.func @transform_1(%arg0: i32) -> (i32, i32) {
    %c0_i32 = arith.constant 0 : i32
    %c0_i32_0 = arith.constant 0 : i32
    %c0_i32_1 = arith.constant 0 : i32
    return %c0_i32, %c0_i32_0 : i32, i32
  }
  func.func @transform_2(%arg0: i32) -> (i32, i32) {
    %c0_i32 = arith.constant 0 : i32
    %c0_i32_0 = arith.constant 0 : i32
    %c0_i32_1 = arith.constant 0 : i32
    return %c0_i32, %c0_i32_0 : i32, i32
  }
  func.func @transform_3(%arg0: i32) -> (i32, i32) {
    %c0_i32 = arith.constant 0 : i32
    %c0_i32_0 = arith.constant 0 : i32
    %c0_i32_1 = arith.constant 0 : i32
    return %c0_i32, %c0_i32_0 : i32, i32
  }
  func.func @transform_4(%arg0: i32) -> (i32, i32) {
    %c0_i32 = arith.constant 0 : i32
    %c0_i32_0 = arith.constant 0 : i32
    %c0_i32_1 = arith.constant 0 : i32
    return %c0_i32, %c0_i32_0 : i32, i32
  }
  func.func @transform_5(%arg0: i32) -> (i32, i32) {
    %c0_i32 = arith.constant 0 : i32
    %c0_i32_0 = arith.constant 0 : i32
    %c0_i32_1 = arith.constant 0 : i32
    return %c0_i32, %c0_i32_0 : i32, i32
  }
  func.func @transform_6(%arg0: i32) -> (i32, i32) {
    %c0_i32 = arith.constant 0 : i32
    %c0_i32_0 = arith.constant 0 : i32
    %c0_i32_1 = arith.constant 0 : i32
    return %c0_i32, %c0_i32_0 : i32, i32
  }
  func.func @transform_7(%arg0: i32) -> (i32, i32) {
    %c0_i32 = arith.constant 0 : i32
    %c0_i32_0 = arith.constant 0 : i32
    return %arg0, %c0_i32 : i32, i32
  }
}

</mosaic_0001>

<bundles_post_ra>
// kernel: tpu_custom_call.1
= control target key start
LH: loop header
LB: loop body
LE: loop exit
PB: predicated region body
PF: predicated region fallthrough
CT: control target
= control target key end

     0   :  { %s1899_s26 = smov 0   ;;  %s2251_s0 = inlined_call_operand.vmem [shape: f32[512,2], index: 0, kind: input, shape index: {}]   ;;  %s2252_s1 = inlined_call_operand.vmem [shape: f32[2,16], index: 1, kind: input, shape index: {}]   ;;  %s2253_s2 = inlined_call_operand.vmem [shape: f32[1,16], index: 2, kind: input, shape index: {}]   ;;  %s2254_s3 = inlined_call_operand.vmem [shape: f32[16,16], index: 3, kind: input, shape index: {}]   ;;  %s2255_s4 = inlined_call_operand.vmem [shape: f32[1,16], index: 4, kind: input, shape index: {}]   ;;  %s2256_s5 = inlined_call_operand.vmem [shape: f32[16,1], index: 5, kind: input, shape index: {}]   ;;  %s2257_s6 = inlined_call_operand.<no memory space> [shape: f32[1,1], index: 6, kind: input, shape index: {}]   ;;  %s2258_s7 = inlined_call_operand.vmem [shape: f32[512,1], index: 7, kind: output, shape index: {}]  }
   0x1   :  { %v12_v0 = vstv %s2257_s6 }
   0x2   :  { %13 = vst [vmem:[#allocation2] sm:$0x1] %v12_v0 }
   0x3 LB: > { %s1464_s27 = sadd.s32 4294967295, %s1854_s26   ;;  %p1468_p0 = scmp.ge.s32.totalorder %s1854_s26, 1  ;;  %s1854_s26 = sphi %s1899_s26, %s19_s26  }
   0x4   : > { %p240_p1 = scmp.lt.s32.totalorder %s1854_s26, 3 }
   0x6   : > { %p241_p2 = pnand %p1468_p0, %p240_p1 }
   0x7   : > { %v316_v1 = vld [vmem:[%s2252_s1] sm:$0x3] (!%p241_p2)  ;;  %vm421_vm0 = vcmask (!%p241_p2), 1041408   ;;  %s1469_s6 = sshll.u32 (!%p241_p2), %s1464_s27, 5  ;;  %v683_v3 = vld [vmem:[%s2254_s3 + $0x8] sm:$0xff] (!%p241_p2)  ;;  %vm324_vm1 = vcmask (!%p241_p2), 15360  }
   0x8   : > { %244 = sbr.rel (%p241_p2) target bundleno = 732 (0x2dc), region = 48  ;;  %v682_v2 = vld [vmem:[%s2254_s3] sm:$0xff] (!%p241_p2)  ;;  %1676 = vmatprep.subr.msk.mxu0 (!%p241_p2), %vm421_vm0, %v316_v1  ;;  %p273_p3 = scmp.lt.s32.totalorder (!%p241_p2), %s1469_s6, 63  ;;  %1838 = vmatprep.subr.msk.mxu1 (!%p241_p2), %vm421_vm0, %v316_v1  ;;  %v1046_v38 = vld [vmem:[%s2256_s5 + $0x8] sm:$0xff] (!%p241_p2)  ;;  %vm691_vm2 = vcmask (!%p241_p2), 130048   ;;  %vm1375_vm3 = vcmask (!%p241_p2), 7168  }
   0x9   : > { %1677 = vmatpush3.msk.msra.mxu0 (!%p241_p2), %vm421_vm0, %v316_v1  ;;  %1839 = vmatpush3.msk.msra.mxu1 (!%p241_p2), %vm421_vm0, %v316_v1  ;;  %v1830_v4 = vpack.c.bf16 (!%p241_p2), %v683_v3, %v682_v2  ;;  %v1045_v37 = vld [vmem:[%s2256_s5] sm:$0xff] (!%p241_p2) }
   0xa   : > { %v1834_v39 = vpack.c.bf16 (!%p241_p2), %v1046_v38, %v1045_v37  ;;  %v1999_v40 = vld [vmem:[%s2253_s2] ss:$0 sm:$0xff] (!%p241_p2) }
   0xb   : > { %1831 = vmatprep.subr.bf16.mxu1 (!%p241_p2), %v1830_v4 }
   0xc   : > { %1835 = vmatprep.subr.bf16.mxu0 (!%p241_p2), %v1834_v39 }
   0xf   : > { %s2260_s6 = smov (!%p273_p3, %s1469_s6), 63 }
  0x10   : > { %s1470_s11 = sshll.u32 %s2260_s6, 3 }
  0x11   : > { %s1924_s14 = scalar_lea.vmem %s2251_s0, %s1470_s11  ;;  %s2150_s25 = scalar_lea.vmem %s2258_s7, %s1470_s11 }
  0x12   : > { %v284_v5 = vld [vmem:[%s1924_s14] sm:$0xff]  ;;  %v285_v6 = vld [vmem:[%s1924_s14 + $0x8] sm:$0xff]  ;;  %v286_v7 = vld [vmem:[%s1924_s14 + $0x10] sm:$0xff] }
  0x13   : > { %1678 = vmatprep.mubr.msk.f32.mxu0 %vm324_vm1, %v284_v5  ;;  %v287_v8 = vld [vmem:[%s1924_s14 + $0x18] sm:$0xff]  ;;  %v288_v9 = vld [vmem:[%s1924_s14 + $0x20] sm:$0xff]  ;;  %v301_v11 = vld [vmem:[%s1924_s14 + $0x88] sm:$0xff] }
  0x14   : > { %1679 = vmatmul.mubr.msk.f32.vlgmr.msra.gmra.mrb[0].mxu0 %vm324_vm1, %v285_v6  ;;  %v300_v10 = vld [vmem:[%s1924_s14 + $0x80] sm:$0xff]  ;;  %v302_v12 = vld [vmem:[%s1924_s14 + $0x90] sm:$0xff]  ;;  %v289_v13 = vld [vmem:[%s1924_s14 + $0x28] sm:$0xff] }
  0x15   : > { %1681 = vmatprep.mubr.msk.f32.mxu0 %vm324_vm1, %v286_v7  ;;  %1702 = vmatprep.mubr.msk.f32.mxu1 %vm324_vm1, %v300_v10  ;;  %v290_v14 = vld [vmem:[%s1924_s14 + $0x30] sm:$0xff]  ;;  %v303_v15 = vld [vmem:[%s1924_s14 + $0x98] sm:$0xff]  ;;  %v304_v16 = vld [vmem:[%s1924_s14 + $0xa0] sm:$0xff] }
  0x16   : > { %1703 = vmatmul.mubr.msk.f32.vlgmr.msra.gmra.mrb[0].mxu1 %vm324_vm1, %v301_v11  ;;  %v291_v17 = vld [vmem:[%s1924_s14 + $0x38] sm:$0xff]  ;;  %v292_v18 = vld [vmem:[%s1924_s14 + $0x40] sm:$0xff]  ;;  %v305_v19 = vld [vmem:[%s1924_s14 + $0xa8] sm:$0xff]  ;;  %1837 = vmatpush3.bf16.msra.mxu0 %v1834_v39 }
  0x17   : > { %1705 = vmatprep.mubr.msk.f32.mxu1 %vm324_vm1, %v302_v12  ;;  %1833 = vmatpush3.bf16.msra.mxu1 %v1830_v4  ;;  %v306_v20 = vld [vmem:[%s1924_s14 + $0xb0] sm:$0xff]  ;;  %v293_v21 = vld [vmem:[%s1924_s14 + $0x48] sm:$0xff]  ;;  %v307_v23 = vld [vmem:[%s1924_s14 + $0xb8] sm:$0xff] }
  0x18   : > { %1682 = vmatmul.mubr.msk.f32.gmra.mrb[2].mxu0 %vm324_vm1, %v287_v8  ;;  %v294_v22 = vld [vmem:[%s1924_s14 + $0x50] sm:$0xff]  ;;  %v308_v24 = vld [vmem:[%s1924_s14 + $0xc0] sm:$0xff]  ;;  %v295_v25 = vld [vmem:[%s1924_s14 + $0x58] sm:$0xff] }
  0x19   : > { %1684 = vmatprep.mubr.msk.f32.mxu0 %vm324_vm1, %v288_v9  ;;  %v296_v26 = vld [vmem:[%s1924_s14 + $0x60] sm:$0xff]  ;;  %v309_v27 = vld [vmem:[%s1924_s14 + $0xc8] sm:$0xff]  ;;  %v310_v28 = vld [vmem:[%s1924_s14 + $0xd0] sm:$0xff] }
  0x1a   : > { %1706 = vmatmul.mubr.msk.f32.gmra.mrb[2].mxu1 %vm324_vm1, %v303_v15  ;;  %v297_v29 = vld [vmem:[%s1924_s14 + $0x68] sm:$0xff]  ;;  %v298_v30 = vld [vmem:[%s1924_s14 + $0x70] sm:$0xff]  ;;  %v311_v31 = vld [vmem:[%s1924_s14 + $0xd8] sm:$0xff] }
  0x1b   : > { %1708 = vmatprep.mubr.msk.f32.mxu1 %vm324_vm1, %v304_v16  ;;  %v312_v32 = vld [vmem:[%s1924_s14 + $0xe0] sm:$0xff]  ;;  %v299_v33 = vld [vmem:[%s1924_s14 + $0x78] sm:$0xff]  ;;  %v313_v34 = vld [vmem:[%s1924_s14 + $0xe8] sm:$0xff] }
  0x1c   : > { %1685 = vmatmul.mubr.msk.f32.gmra.mrb[4].mxu0 %vm324_vm1, %v289_v13  ;;  %v314_v35 = vld [vmem:[%s1924_s14 + $0xf0] sm:$0xff]  ;;  %v315_v36 = vld [vmem:[%s1924_s14 + $0xf8] sm:$0xff] }
  0x1d   : > { %1687 = vmatprep.mubr.msk.f32.mxu0 %vm324_vm1, %v290_v14 }
  0x1e   : > { %1709 = vmatmul.mubr.msk.f32.gmra.mrb[4].mxu1 %vm324_vm1, %v305_v19 }
  0x1f   : > { %1711 = vmatprep.mubr.msk.f32.mxu1 %vm324_vm1, %v306_v20 }
  0x20   : > { %1688 = vmatmul.mubr.msk.f32.gmra.mrb[6].mxu0 %vm324_vm1, %v291_v17 }
  0x21   : > { %1690 = vmatprep.mubr.msk.f32.mxu0 %vm324_vm1, %v292_v18 }
  0x22   : > { %1712 = vmatmul.mubr.msk.f32.gmra.mrb[6].mxu1 %vm324_vm1, %v307_v23 }
  0x23   : > { %1714 = vmatprep.mubr.msk.f32.mxu1 %vm324_vm1, %v308_v24 }
  0x24   : > { %1691 = vmatmul.mubr.msk.f32.gmra.mrb[8].mxu0 %vm324_vm1, %v293_v21 }
  0x25   : > { %1693 = vmatprep.mubr.msk.f32.mxu0 %vm324_vm1, %v294_v22 }
  0x26   : > { %1715 = vmatmul.mubr.msk.f32.gmra.mrb[8].mxu1 %vm324_vm1, %v309_v27 }
  0x27   : > { %1717 = vmatprep.mubr.msk.f32.mxu1 %vm324_vm1, %v310_v28 }
  0x28   : > { %1694 = vmatmul.mubr.msk.f32.gmra.mrb[10].mxu0 %vm324_vm1, %v295_v25 }
  0x29   : > { %1696 = vmatprep.mubr.msk.f32.mxu0 %vm324_vm1, %v296_v26 }
  0x2a   : > { %1718 = vmatmul.mubr.msk.f32.gmra.mrb[10].mxu1 %vm324_vm1, %v311_v31 }
  0x2b   : > { %1720 = vmatprep.mubr.msk.f32.mxu1 %vm324_vm1, %v312_v32 }
  0x2c   : > { %1697 = vmatmul.mubr.msk.f32.gmra.mrb[12].mxu0 %vm324_vm1, %v297_v29 }
  0x2d   : > { %1699 = vmatprep.mubr.msk.f32.mxu0 %vm324_vm1, %v298_v30 }
  0x2e   : > { %1721 = vmatmul.mubr.msk.f32.gmra.mrb[12].mxu1 %vm324_vm1, %v313_v34 }
  0x2f   : > { %1723 = vmatprep.mubr.msk.f32.mxu1 %vm324_vm1, %v314_v35 }
  0x30   : > { %1700 = vmatmul.mubr.msk.f32.gmra.mrb[14].mxu0 %vm324_vm1, %v299_v33 }
  0x32   : > { %1724 = vmatmul.mubr.msk.f32.gmra.mrb[14].mxu1 %vm324_vm1, %v315_v36 }
  0xe7   : > { %v1680_v41 = vpop.f32.mrb[0].mxu0 }
  0xe8   : > { %v497_v42 = vadd.f32 %v1680_v41, %v1999_v40  ;;  %v491_v43 = vpop.f32.mrb[1].mxu0 }
  0xe9   : > { %v492_v44 = vadd.f32 %v1999_v40, %v491_v43  ;;  %v2004_v50 = vpop.f32.mrb[0].mxu1 }
  0xea   : > { %v651_v47 = vmax.f32 %v497_v42, 0.0  ;;  %v571_v52 = vpop.f32.mrb[1].mxu1  ;;  %v577_v43 = vadd.f32 %v2004_v50, %v1999_v40 }
  0xeb   : > { %v650_v45 = vmax.f32 %v492_v44, 0.0  ;;  %v1683_v46 = vpop.f32.mrb[2].mxu0  ;;  %v572_v31 = vadd.f32 %v1999_v40, %v571_v52 }
  0xec   : > { %v507_v48 = vadd.f32 %v1683_v46, %v1999_v40  ;;  %v501_v49 = vpop.f32.mrb[3].mxu0 }
  0xed   : > { %v502_v51 = vadd.f32 %v1999_v40, %v501_v49  ;;  %1730 = vmatprep.mubr.msk.f32.mxu1 %vm691_vm2, %v650_v45  ;;  %v2010_v58 = vpop.f32.mrb[2].mxu1  ;;  %v666_v39 = vmax.f32 %v572_v31, 0.0 }
  0xee   : > { %1731 = vmatmul.mubr.msk.f32.vlgmr.msra.gmra.mrb[16].mxu1 %vm691_vm2, %v651_v47  ;;  %v653_v55 = vmax.f32 %v507_v48, 0.0  ;;  %v581_v60 = vpop.f32.mrb[3].mxu1  ;;  %v667_v48 = vmax.f32 %v577_v43, 0.0  ;;  %v587_v49 = vadd.f32 %v2010_v58, %v1999_v40 }
  0xef   : > { %v652_v53 = vmax.f32 %v502_v51, 0.0  ;;  %v1686_v54 = vpop.f32.mrb[4].mxu0  ;;  %v582_v41 = vadd.f32 %v1999_v40, %v581_v60 }
  0xf0   : > { %v517_v56 = vadd.f32 %v1686_v54, %v1999_v40  ;;  %v511_v57 = vpop.f32.mrb[5].mxu0  ;;  %v669_v52 = vmax.f32 %v587_v49, 0.0 }
  0xf1   : > { %v512_v59 = vadd.f32 %v1999_v40, %v511_v57  ;;  %1733 = vmatprep.mubr.msk.f32.mxu1 %vm691_vm2, %v652_v53  ;;  %v2016_v2 = vpop.f32.mrb[4].mxu1  ;;  %v668_v46 = vmax.f32 %v582_v41, 0.0 }
  0xf2   : > { %1734 = vmatmul.mubr.msk.f32.gmra.mrb[18].mxu1 %vm691_vm2, %v653_v55  ;;  %v655_v63 = vmax.f32 %v517_v56, 0.0  ;;  %v591_v4 = vpop.f32.mrb[5].mxu1  ;;  %v597_v53 = vadd.f32 %v2016_v2, %v1999_v40 }
  0xf3   : > { %v654_v61 = vmax.f32 %v512_v59, 0.0  ;;  %v1689_v62 = vpop.f32.mrb[6].mxu0  ;;  %v592_v47 = vadd.f32 %v1999_v40, %v591_v4 }
  0xf4   : > { %v527_v0 = vadd.f32 %v1689_v62, %v1999_v40  ;;  %v521_v1 = vpop.f32.mrb[7].mxu0  ;;  %v671_v56 = vmax.f32 %v597_v53, 0.0 }
  0xf5   : > { %v522_v3 = vadd.f32 %v1999_v40, %v521_v1  ;;  %1736 = vmatprep.mubr.msk.f32.mxu1 %vm691_vm2, %v654_v61  ;;  %v1713_v10 = vpop.f32.mrb[6].mxu1  ;;  %v670_v51 = vmax.f32 %v592_v47, 0.0 }
  0xf6   : > { %1737 = vmatmul.mubr.msk.f32.gmra.mrb[20].mxu1 %vm691_vm2, %v655_v63  ;;  %v657_v7 = vmax.f32 %v527_v0, 0.0  ;;  %v601_v12 = vpop.f32.mrb[7].mxu1  ;;  %v607_v57 = vadd.f32 %v1713_v10, %v1999_v40  ;;  %v2077_v10 = vld [vmem:[%s2255_s4] ss:$0 sm:$0xff] }
  0xf7   : > { %v656_v5 = vmax.f32 %v522_v3, 0.0  ;;  %v1692_v6 = vpop.f32.mrb[8].mxu0  ;;  %v602_v50 = vadd.f32 %v1999_v40, %v601_v12 }
  0xf8   : > { %v537_v8 = vadd.f32 %v1692_v6, %v1999_v40  ;;  %v531_v9 = vpop.f32.mrb[9].mxu0  ;;  %v673_v60 = vmax.f32 %v607_v57, 0.0 }
  0xf9   : > { %v532_v11 = vadd.f32 %v1999_v40, %v531_v9  ;;  %1739 = vmatprep.mubr.msk.f32.mxu1 %vm691_vm2, %v656_v5  ;;  %v1716_v18 = vpop.f32.mrb[8].mxu1  ;;  %v672_v54 = vmax.f32 %v602_v50, 0.0 }
  0xfa   : > { %1740 = vmatmul.mubr.msk.f32.gmra.mrb[22].mxu1 %vm691_vm2, %v657_v7  ;;  %v659_v15 = vmax.f32 %v537_v8, 0.0  ;;  %v611_v20 = vpop.f32.mrb[9].mxu1  ;;  %v617_v61 = vadd.f32 %v1716_v18, %v1999_v40 }
  0xfb   : > { %v658_v13 = vmax.f32 %v532_v11, 0.0  ;;  %v1695_v14 = vpop.f32.mrb[10].mxu0  ;;  %v612_v55 = vadd.f32 %v1999_v40, %v611_v20 }
  0xfc   : > { %v547_v16 = vadd.f32 %v1695_v14, %v1999_v40  ;;  %v541_v17 = vpop.f32.mrb[11].mxu0  ;;  %v675_v0 = vmax.f32 %v617_v61, 0.0 }
  0xfd   : > { %v542_v19 = vadd.f32 %v1999_v40, %v541_v17  ;;  %1742 = vmatprep.mubr.msk.f32.mxu1 %vm691_vm2, %v658_v13  ;;  %v1719_v26 = vpop.f32.mrb[10].mxu1  ;;  %v674_v58 = vmax.f32 %v612_v55, 0.0 }
  0xfe   : > { %1743 = vmatmul.mubr.msk.f32.gmra.mrb[24].mxu1 %vm691_vm2, %v659_v15  ;;  %v661_v23 = vmax.f32 %v547_v16, 0.0  ;;  %v621_v28 = vpop.f32.mrb[11].mxu1  ;;  %v627_v1 = vadd.f32 %v1719_v26, %v1999_v40 }
  0xff   : > { %v660_v21 = vmax.f32 %v542_v19, 0.0  ;;  %v1698_v22 = vpop.f32.mrb[12].mxu0  ;;  %v622_v59 = vadd.f32 %v1999_v40, %v621_v28 }
 0x100   : > { %v557_v24 = vadd.f32 %v1698_v22, %v1999_v40  ;;  %v551_v25 = vpop.f32.mrb[13].mxu0  ;;  %v677_v4 = vmax.f32 %v627_v1, 0.0 }
 0x101   : > { %v552_v27 = vadd.f32 %v1999_v40, %v551_v25  ;;  %1745 = vmatprep.mubr.msk.f32.mxu1 %vm691_vm2, %v660_v21  ;;  %v1722_v35 = vpop.f32.mrb[12].mxu1  ;;  %v676_v62 = vmax.f32 %v622_v59, 0.0 }
 0x102   : > { %1746 = vmatmul.mubr.msk.f32.gmra.mrb[26].mxu1 %vm691_vm2, %v661_v23  ;;  %v663_v32 = vmax.f32 %v557_v24, 0.0  ;;  %v631_v37 = vpop.f32.mrb[13].mxu1  ;;  %v637_v5 = vadd.f32 %v1722_v35, %v1999_v40 }
 0x103   : > { %v662_v29 = vmax.f32 %v552_v27, 0.0  ;;  %v1701_v30 = vpop.f32.mrb[14].mxu0  ;;  %v632_v63 = vadd.f32 %v1999_v40, %v631_v37 }
 0x104   : > { %v567_v33 = vadd.f32 %v1701_v30, %v1999_v40  ;;  %v561_v34 = vpop.f32.mrb[15].mxu0  ;;  %v679_v7 = vmax.f32 %v637_v5, 0.0 }
 0x105   : > { %v562_v36 = vadd.f32 %v1999_v40, %v561_v34  ;;  %1748 = vmatprep.mubr.msk.f32.mxu1 %vm691_vm2, %v662_v29  ;;  %v1725_v44 = vpop.f32.mrb[14].mxu1  ;;  %v678_v2 = vmax.f32 %v632_v63, 0.0 }
 0x106   : > { %1749 = vmatmul.mubr.msk.f32.gmra.mrb[28].mxu1 %vm691_vm2, %v663_v32  ;;  %v665_v42 = vmax.f32 %v567_v33, 0.0  ;;  %v641_v45 = vpop.f32.mrb[15].mxu1  ;;  %v647_v8 = vadd.f32 %v1725_v44, %v1999_v40 }
 0x107   : > { %v664_v38 = vmax.f32 %v562_v36, 0.0  ;;  %v642_v3 = vadd.f32 %v1999_v40, %v641_v45 }
 0x108   : > { %v681_v9 = vmax.f32 %v647_v8, 0.0 }
 0x109   : > { %1751 = vmatprep.mubr.msk.f32.mxu1 %vm691_vm2, %v664_v38  ;;  %v680_v6 = vmax.f32 %v642_v3, 0.0 }
 0x10a   : > { %1752 = vmatmul.mubr.msk.f32.gmra.mrb[30].mxu1 %vm691_vm2, %v665_v42 }
 0x10b   : > { %1754 = vmatprep.mubr.msk.f32.mxu1 %vm691_vm2, %v666_v39 }
 0x10e   : > { %1755 = vmatmul.mubr.msk.f32.gmra.mrb[32].mxu1 %vm691_vm2, %v667_v48 }
 0x10f   : > { %1757 = vmatprep.mubr.msk.f32.mxu1 %vm691_vm2, %v668_v46 }
 0x112   : > { %1758 = vmatmul.mubr.msk.f32.gmra.mrb[34].mxu1 %vm691_vm2, %v669_v52 }
 0x113   : > { %1760 = vmatprep.mubr.msk.f32.mxu1 %vm691_vm2, %v670_v51 }
 0x116   : > { %1761 = vmatmul.mubr.msk.f32.gmra.mrb[36].mxu1 %vm691_vm2, %v671_v56 }
 0x117   : > { %1763 = vmatprep.mubr.msk.f32.mxu1 %vm691_vm2, %v672_v54 }
 0x11a   : > { %1764 = vmatmul.mubr.msk.f32.gmra.mrb[38].mxu1 %vm691_vm2, %v673_v60 }
 0x11b   : > { %1766 = vmatprep.mubr.msk.f32.mxu1 %vm691_vm2, %v674_v58 }
 0x11e   : > { %1767 = vmatmul.mubr.msk.f32.gmra.mrb[40].mxu1 %vm691_vm2, %v675_v0 }
 0x11f   : > { %1769 = vmatprep.mubr.msk.f32.mxu1 %vm691_vm2, %v676_v62 }
 0x122   : > { %1770 = vmatmul.mubr.msk.f32.gmra.mrb[42].mxu1 %vm691_vm2, %v677_v4 }
 0x123   : > { %1772 = vmatprep.mubr.msk.f32.mxu1 %vm691_vm2, %v678_v2 }
 0x126   : > { %1773 = vmatmul.mubr.msk.f32.gmra.mrb[44].mxu1 %vm691_vm2, %v679_v7 }
 0x127   : > { %1775 = vmatprep.mubr.msk.f32.mxu1 %vm691_vm2, %v680_v6 }
 0x12a   : > { %1776 = vmatmul.mubr.msk.f32.gmra.mrb[46].mxu1 %vm691_vm2, %v681_v9 }
 0x1c1   : > { %v1732_v11 = vpop.f32.mrb[16].mxu1 }
 0x1c2   : > { %v860_v12 = vadd.f32 %v1732_v11, %v2077_v10  ;;  %v854_v13 = vpop.f32.mrb[17].mxu1 }
 0x1c3   : > { %v855_v14 = vadd.f32 %v2077_v10, %v854_v13 }
 0x1c4   : > { %v1014_v16 = vmax.f32 %v860_v12, 0.0 }
 0x1c5   : > { %v1013_v15 = vmax.f32 %v855_v14, 0.0  ;;  %v1735_v40 = vpop.f32.mrb[18].mxu1 }
 0x1c6   : > { %v870_v17 = vadd.f32 %v1735_v40, %v2077_v10  ;;  %v864_v18 = vpop.f32.mrb[19].mxu1 }
 0x1c7   : > { %v865_v19 = vadd.f32 %v2077_v10, %v864_v18  ;;  %1782 = vmatprep.mubr.msk.f32.mxu0 %vm691_vm2, %v1013_v15 }
 0x1c8   : > { %1783 = vmatmul.mubr.msk.f32.vlgmr.msra.gmra.mrb[16].mxu0 %vm691_vm2, %v1014_v16  ;;  %v1016_v22 = vmax.f32 %v870_v17, 0.0 }
 0x1c9   : > { %v1015_v20 = vmax.f32 %v865_v19, 0.0  ;;  %v1738_v21 = vpop.f32.mrb[20].mxu1 }
 0x1ca   : > { %v880_v23 = vadd.f32 %v1738_v21, %v2077_v10  ;;  %v874_v24 = vpop.f32.mrb[21].mxu1 }
 0x1cb   : > { %v875_v25 = vadd.f32 %v2077_v10, %v874_v24  ;;  %1785 = vmatprep.mubr.msk.f32.mxu0 %vm691_vm2, %v1015_v20 }
 0x1cc   : > { %1786 = vmatmul.mubr.msk.f32.gmra.mrb[18].mxu0 %vm691_vm2, %v1016_v22  ;;  %v1018_v28 = vmax.f32 %v880_v23, 0.0 }
 0x1cd   : > { %v1017_v26 = vmax.f32 %v875_v25, 0.0  ;;  %v1741_v27 = vpop.f32.mrb[22].mxu1 }
 0x1ce   : > { %v890_v29 = vadd.f32 %v1741_v27, %v2077_v10  ;;  %v884_v30 = vpop.f32.mrb[23].mxu1 }
 0x1cf   : > { %v885_v31 = vadd.f32 %v2077_v10, %v884_v30  ;;  %1788 = vmatprep.mubr.msk.f32.mxu0 %vm691_vm2, %v1017_v26 }
 0x1d0   : > { %1789 = vmatmul.mubr.msk.f32.gmra.mrb[20].mxu0 %vm691_vm2, %v1018_v28  ;;  %v1020_v34 = vmax.f32 %v890_v29, 0.0 }
 0x1d1   : > { %v1019_v32 = vmax.f32 %v885_v31, 0.0  ;;  %v1744_v33 = vpop.f32.mrb[24].mxu1 }
 0x1d2   : > { %v900_v35 = vadd.f32 %v1744_v33, %v2077_v10  ;;  %v894_v36 = vpop.f32.mrb[25].mxu1 }
 0x1d3   : > { %v895_v37 = vadd.f32 %v2077_v10, %v894_v36  ;;  %1791 = vmatprep.mubr.msk.f32.mxu0 %vm691_vm2, %v1019_v32 }
 0x1d4   : > { %1792 = vmatmul.mubr.msk.f32.gmra.mrb[22].mxu0 %vm691_vm2, %v1020_v34  ;;  %v1022_v41 = vmax.f32 %v900_v35, 0.0 }
 0x1d5   : > { %v1021_v38 = vmax.f32 %v895_v37, 0.0  ;;  %v1747_v39 = vpop.f32.mrb[26].mxu1 }
 0x1d6   : > { %v910_v42 = vadd.f32 %v1747_v39, %v2077_v10  ;;  %v904_v43 = vpop.f32.mrb[27].mxu1 }
 0x1d7   : > { %v905_v44 = vadd.f32 %v2077_v10, %v904_v43  ;;  %1794 = vmatprep.mubr.msk.f32.mxu0 %vm691_vm2, %v1021_v38 }
 0x1d8   : > { %1795 = vmatmul.mubr.msk.f32.gmra.mrb[24].mxu0 %vm691_vm2, %v1022_v41  ;;  %v1024_v47 = vmax.f32 %v910_v42, 0.0 }
 0x1d9   : > { %v1023_v45 = vmax.f32 %v905_v44, 0.0  ;;  %v1750_v46 = vpop.f32.mrb[28].mxu1  ;;  %v2143_v44 = vld [vmem:[#allocation2] ss:$0 sm:$0xff] }
 0x1da   : > { %v920_v48 = vadd.f32 %v1750_v46, %v2077_v10  ;;  %v914_v49 = vpop.f32.mrb[29].mxu1 }
 0x1db   : > { %v915_v51 = vadd.f32 %v2077_v10, %v914_v49  ;;  %1797 = vmatprep.mubr.msk.f32.mxu0 %vm691_vm2, %v1023_v45 }
 0x1dc   : > { %1798 = vmatmul.mubr.msk.f32.gmra.mrb[26].mxu0 %vm691_vm2, %v1024_v47  ;;  %v1026_v53 = vmax.f32 %v920_v48, 0.0 }
 0x1dd   : > { %v1025_v50 = vmax.f32 %v915_v51, 0.0  ;;  %v1753_v52 = vpop.f32.mrb[30].mxu1 }
 0x1de   : > { %v930_v54 = vadd.f32 %v1753_v52, %v2077_v10  ;;  %v924_v55 = vpop.f32.mrb[31].mxu1 }
 0x1df   : > { %v925_v56 = vadd.f32 %v2077_v10, %v924_v55  ;;  %1800 = vmatprep.mubr.msk.f32.mxu0 %vm691_vm2, %v1025_v50 }
 0x1e0   : > { %1801 = vmatmul.mubr.msk.f32.gmra.mrb[28].mxu0 %vm691_vm2, %v1026_v53  ;;  %v1028_v59 = vmax.f32 %v930_v54, 0.0 }
 0x1e1   : > { %v1027_v57 = vmax.f32 %v925_v56, 0.0  ;;  %v1756_v58 = vpop.f32.mrb[32].mxu1 }
 0x1e2   : > { %v940_v60 = vadd.f32 %v1756_v58, %v2077_v10  ;;  %v934_v61 = vpop.f32.mrb[33].mxu1 }
 0x1e3   : > { %v935_v62 = vadd.f32 %v2077_v10, %v934_v61  ;;  %1803 = vmatprep.mubr.msk.f32.mxu0 %vm691_vm2, %v1027_v57 }
 0x1e4   : > { %1804 = vmatmul.mubr.msk.f32.gmra.mrb[30].mxu0 %vm691_vm2, %v1028_v59  ;;  %v1030_v1 = vmax.f32 %v940_v60, 0.0 }
 0x1e5   : > { %v1029_v63 = vmax.f32 %v935_v62, 0.0  ;;  %v1759_v0 = vpop.f32.mrb[34].mxu1 }
 0x1e6   : > { %v950_v2 = vadd.f32 %v1759_v0, %v2077_v10  ;;  %v944_v3 = vpop.f32.mrb[35].mxu1 }
 0x1e7   : > { %v945_v4 = vadd.f32 %v2077_v10, %v944_v3  ;;  %1806 = vmatprep.mubr.msk.f32.mxu0 %vm691_vm2, %v1029_v63 }
 0x1e8   : > { %1807 = vmatmul.mubr.msk.f32.gmra.mrb[32].mxu0 %vm691_vm2, %v1030_v1  ;;  %v1032_v7 = vmax.f32 %v950_v2, 0.0 }
 0x1e9   : > { %v1031_v5 = vmax.f32 %v945_v4, 0.0  ;;  %v1762_v6 = vpop.f32.mrb[36].mxu1 }
 0x1ea   : > { %v960_v8 = vadd.f32 %v1762_v6, %v2077_v10  ;;  %v954_v9 = vpop.f32.mrb[37].mxu1 }
 0x1eb   : > { %v955_v11 = vadd.f32 %v2077_v10, %v954_v9  ;;  %1809 = vmatprep.mubr.msk.f32.mxu0 %vm691_vm2, %v1031_v5 }
 0x1ec   : > { %1810 = vmatmul.mubr.msk.f32.gmra.mrb[34].mxu0 %vm691_vm2, %v1032_v7  ;;  %v1034_v14 = vmax.f32 %v960_v8, 0.0 }
 0x1ed   : > { %v1033_v12 = vmax.f32 %v955_v11, 0.0  ;;  %v1765_v13 = vpop.f32.mrb[38].mxu1 }
 0x1ee   : > { %v970_v15 = vadd.f32 %v1765_v13, %v2077_v10  ;;  %v964_v40 = vpop.f32.mrb[39].mxu1 }
 0x1ef   : > { %v965_v16 = vadd.f32 %v2077_v10, %v964_v40  ;;  %1812 = vmatprep.mubr.msk.f32.mxu0 %vm691_vm2, %v1033_v12 }
 0x1f0   : > { %1813 = vmatmul.mubr.msk.f32.gmra.mrb[36].mxu0 %vm691_vm2, %v1034_v14  ;;  %v1036_v19 = vmax.f32 %v970_v15, 0.0 }
 0x1f1   : > { %v1035_v17 = vmax.f32 %v965_v16, 0.0  ;;  %v1768_v18 = vpop.f32.mrb[40].mxu1 }
 0x1f2   : > { %v980_v20 = vadd.f32 %v1768_v18, %v2077_v10  ;;  %v974_v21 = vpop.f32.mrb[41].mxu1 }
 0x1f3   : > { %v975_v22 = vadd.f32 %v2077_v10, %v974_v21  ;;  %1815 = vmatprep.mubr.msk.f32.mxu0 %vm691_vm2, %v1035_v17 }
 0x1f4   : > { %1816 = vmatmul.mubr.msk.f32.gmra.mrb[38].mxu0 %vm691_vm2, %v1036_v19  ;;  %v1038_v25 = vmax.f32 %v980_v20, 0.0 }
 0x1f5   : > { %v1037_v23 = vmax.f32 %v975_v22, 0.0  ;;  %v1771_v24 = vpop.f32.mrb[42].mxu1 }
 0x1f6   : > { %v990_v26 = vadd.f32 %v1771_v24, %v2077_v10  ;;  %v984_v27 = vpop.f32.mrb[43].mxu1 }
 0x1f7   : > { %v985_v28 = vadd.f32 %v2077_v10, %v984_v27  ;;  %1818 = vmatprep.mubr.msk.f32.mxu0 %vm691_vm2, %v1037_v23 }
 0x1f8   : > { %1819 = vmatmul.mubr.msk.f32.gmra.mrb[40].mxu0 %vm691_vm2, %v1038_v25  ;;  %v1040_v31 = vmax.f32 %v990_v26, 0.0 }
 0x1f9   : > { %v1039_v29 = vmax.f32 %v985_v28, 0.0  ;;  %v1774_v30 = vpop.f32.mrb[44].mxu1 }
 0x1fa   : > { %v1000_v32 = vadd.f32 %v1774_v30, %v2077_v10  ;;  %v994_v33 = vpop.f32.mrb[45].mxu1 }
 0x1fb   : > { %v995_v34 = vadd.f32 %v2077_v10, %v994_v33  ;;  %1821 = vmatprep.mubr.msk.f32.mxu0 %vm691_vm2, %v1039_v29 }
 0x1fc   : > { %1822 = vmatmul.mubr.msk.f32.gmra.mrb[42].mxu0 %vm691_vm2, %v1040_v31  ;;  %v1042_v37 = vmax.f32 %v1000_v32, 0.0 }
 0x1fd   : > { %v1041_v35 = vmax.f32 %v995_v34, 0.0  ;;  %v1777_v36 = vpop.f32.mrb[46].mxu1 }
 0x1fe   : > { %v1010_v38 = vadd.f32 %v1777_v36, %v2077_v10  ;;  %v1004_v39 = vpop.f32.mrb[47].mxu1 }
 0x1ff   : > { %v1005_v41 = vadd.f32 %v2077_v10, %v1004_v39  ;;  %1824 = vmatprep.mubr.msk.f32.mxu0 %vm691_vm2, %v1041_v35 }
 0x200   : > { %1825 = vmatmul.mubr.msk.f32.gmra.mrb[44].mxu0 %vm691_vm2, %v1042_v37  ;;  %v1044_v43 = vmax.f32 %v1010_v38, 0.0 }
 0x201   : > { %v1043_v42 = vmax.f32 %v1005_v41, 0.0 }
 0x203   : > { %1827 = vmatprep.mubr.msk.f32.mxu0 %vm691_vm2, %v1043_v42 }
 0x204   : > { %1828 = vmatmul.mubr.msk.f32.gmra.mrb[46].mxu0 %vm691_vm2, %v1044_v43 }
 0x29b   : > { %v1784_v10 = vpop.f32.mrb[16].mxu0 }
 0x29c   : > { %v1222_v45 = vadd.f32 %v1784_v10, %v2143_v44  ;;  %v1216_v46 = vpop.f32.mrb[17].mxu0 }
 0x29d   : > { %v1217_v47 = vadd.f32 %v2143_v44, %v1216_v46 }
 0x29e   : > { %1377 = vst.msk [vmem:[%s2150_s25 + $0x8] sm:$0xff] %vm1375_vm3, %v1222_v45 }
 0x29f   : > { %1376 = vst.msk [vmem:[%s2150_s25] sm:$0xff] %vm1375_vm3, %v1217_v47  ;;  %v1787_v48 = vpop.f32.mrb[18].mxu0 }
 0x2a0   : > { %v1232_v49 = vadd.f32 %v1787_v48, %v2143_v44  ;;  %v1226_v51 = vpop.f32.mrb[19].mxu0 }
 0x2a1   : > { %v1227_v50 = vadd.f32 %v2143_v44, %v1226_v51 }
 0x2a2   : > { %1379 = vst.msk [vmem:[%s2150_s25 + $0x18] sm:$0xff] %vm1375_vm3, %v1232_v49 }
 0x2a3   : > { %1378 = vst.msk [vmem:[%s2150_s25 + $0x10] sm:$0xff] %vm1375_vm3, %v1227_v50  ;;  %v1790_v52 = vpop.f32.mrb[20].mxu0 }
 0x2a4   : > { %v1242_v53 = vadd.f32 %v1790_v52, %v2143_v44  ;;  %v1236_v54 = vpop.f32.mrb[21].mxu0 }
 0x2a5   : > { %v1237_v55 = vadd.f32 %v2143_v44, %v1236_v54 }
 0x2a6   : > { %1381 = vst.msk [vmem:[%s2150_s25 + $0x28] sm:$0xff] %vm1375_vm3, %v1242_v53 }
 0x2a7   : > { %1380 = vst.msk [vmem:[%s2150_s25 + $0x20] sm:$0xff] %vm1375_vm3, %v1237_v55  ;;  %v1793_v56 = vpop.f32.mrb[22].mxu0 }
 0x2a8   : > { %v1252_v57 = vadd.f32 %v1793_v56, %v2143_v44  ;;  %v1246_v58 = vpop.f32.mrb[23].mxu0 }
 0x2a9   : > { %v1247_v59 = vadd.f32 %v2143_v44, %v1246_v58 }
 0x2aa   : > { %1383 = vst.msk [vmem:[%s2150_s25 + $0x38] sm:$0xff] %vm1375_vm3, %v1252_v57 }
 0x2ab   : > { %1382 = vst.msk [vmem:[%s2150_s25 + $0x30] sm:$0xff] %vm1375_vm3, %v1247_v59  ;;  %v1796_v60 = vpop.f32.mrb[24].mxu0 }
 0x2ac   : > { %v1262_v61 = vadd.f32 %v1796_v60, %v2143_v44  ;;  %v1256_v62 = vpop.f32.mrb[25].mxu0 }
 0x2ad   : > { %v1257_v63 = vadd.f32 %v2143_v44, %v1256_v62 }
 0x2ae   : > { %1385 = vst.msk [vmem:[%s2150_s25 + $0x48] sm:$0xff] %vm1375_vm3, %v1262_v61 }
 0x2af   : > { %1384 = vst.msk [vmem:[%s2150_s25 + $0x40] sm:$0xff] %vm1375_vm3, %v1257_v63  ;;  %v1799_v0 = vpop.f32.mrb[26].mxu0 }
 0x2b0   : > { %v1272_v1 = vadd.f32 %v1799_v0, %v2143_v44  ;;  %v1266_v2 = vpop.f32.mrb[27].mxu0 }
 0x2b1   : > { %v1267_v3 = vadd.f32 %v2143_v44, %v1266_v2 }
 0x2b2   : > { %1387 = vst.msk [vmem:[%s2150_s25 + $0x58] sm:$0xff] %vm1375_vm3, %v1272_v1 }
 0x2b3   : > { %1386 = vst.msk [vmem:[%s2150_s25 + $0x50] sm:$0xff] %vm1375_vm3, %v1267_v3  ;;  %v1802_v4 = vpop.f32.mrb[28].mxu0 }
 0x2b4   : > { %v1282_v5 = vadd.f32 %v1802_v4, %v2143_v44  ;;  %v1276_v6 = vpop.f32.mrb[29].mxu0 }
 0x2b5   : > { %v1277_v7 = vadd.f32 %v2143_v44, %v1276_v6 }
 0x2b6   : > { %1389 = vst.msk [vmem:[%s2150_s25 + $0x68] sm:$0xff] %vm1375_vm3, %v1282_v5 }
 0x2b7   : > { %1388 = vst.msk [vmem:[%s2150_s25 + $0x60] sm:$0xff] %vm1375_vm3, %v1277_v7  ;;  %v1805_v8 = vpop.f32.mrb[30].mxu0 }
 0x2b8   : > { %v1292_v9 = vadd.f32 %v1805_v8, %v2143_v44  ;;  %v1286_v11 = vpop.f32.mrb[31].mxu0 }
 0x2b9   : > { %v1287_v12 = vadd.f32 %v2143_v44, %v1286_v11 }
 0x2ba   : > { %1391 = vst.msk [vmem:[%s2150_s25 + $0x78] sm:$0xff] %vm1375_vm3, %v1292_v9 }
 0x2bb   : > { %1390 = vst.msk [vmem:[%s2150_s25 + $0x70] sm:$0xff] %vm1375_vm3, %v1287_v12  ;;  %v1808_v13 = vpop.f32.mrb[32].mxu0 }
 0x2bc   : > { %v1302_v14 = vadd.f32 %v1808_v13, %v2143_v44  ;;  %v1296_v15 = vpop.f32.mrb[33].mxu0 }
 0x2bd   : > { %v1297_v40 = vadd.f32 %v2143_v44, %v1296_v15 }
 0x2be   : > { %1393 = vst.msk [vmem:[%s2150_s25 + $0x88] sm:$0xff] %vm1375_vm3, %v1302_v14 }
 0x2bf   : > { %1392 = vst.msk [vmem:[%s2150_s25 + $0x80] sm:$0xff] %vm1375_vm3, %v1297_v40  ;;  %v1811_v16 = vpop.f32.mrb[34].mxu0 }
 0x2c0   : > { %v1312_v17 = vadd.f32 %v1811_v16, %v2143_v44  ;;  %v1306_v18 = vpop.f32.mrb[35].mxu0 }
 0x2c1   : > { %v1307_v19 = vadd.f32 %v2143_v44, %v1306_v18 }
 0x2c2   : > { %1395 = vst.msk [vmem:[%s2150_s25 + $0x98] sm:$0xff] %vm1375_vm3, %v1312_v17 }
 0x2c3   : > { %1394 = vst.msk [vmem:[%s2150_s25 + $0x90] sm:$0xff] %vm1375_vm3, %v1307_v19  ;;  %v1814_v20 = vpop.f32.mrb[36].mxu0 }
 0x2c4   : > { %v1322_v21 = vadd.f32 %v1814_v20, %v2143_v44  ;;  %v1316_v22 = vpop.f32.mrb[37].mxu0 }
 0x2c5   : > { %v1317_v23 = vadd.f32 %v2143_v44, %v1316_v22 }
 0x2c6   : > { %1397 = vst.msk [vmem:[%s2150_s25 + $0xa8] sm:$0xff] %vm1375_vm3, %v1322_v21 }
 0x2c7   : > { %1396 = vst.msk [vmem:[%s2150_s25 + $0xa0] sm:$0xff] %vm1375_vm3, %v1317_v23  ;;  %v1817_v24 = vpop.f32.mrb[38].mxu0 }
 0x2c8   : > { %v1332_v25 = vadd.f32 %v1817_v24, %v2143_v44  ;;  %v1326_v26 = vpop.f32.mrb[39].mxu0 }
 0x2c9   : > { %v1327_v27 = vadd.f32 %v2143_v44, %v1326_v26 }
 0x2ca   : > { %1399 = vst.msk [vmem:[%s2150_s25 + $0xb8] sm:$0xff] %vm1375_vm3, %v1332_v25 }
 0x2cb   : > { %1398 = vst.msk [vmem:[%s2150_s25 + $0xb0] sm:$0xff] %vm1375_vm3, %v1327_v27  ;;  %v1820_v28 = vpop.f32.mrb[40].mxu0 }
 0x2cc   : > { %v1342_v29 = vadd.f32 %v1820_v28, %v2143_v44  ;;  %v1336_v30 = vpop.f32.mrb[41].mxu0 }
 0x2cd   : > { %v1337_v31 = vadd.f32 %v2143_v44, %v1336_v30 }
 0x2ce   : > { %1401 = vst.msk [vmem:[%s2150_s25 + $0xc8] sm:$0xff] %vm1375_vm3, %v1342_v29 }
 0x2cf   : > { %1400 = vst.msk [vmem:[%s2150_s25 + $0xc0] sm:$0xff] %vm1375_vm3, %v1337_v31  ;;  %v1823_v32 = vpop.f32.mrb[42].mxu0 }
 0x2d0   : > { %v1352_v33 = vadd.f32 %v1823_v32, %v2143_v44  ;;  %v1346_v34 = vpop.f32.mrb[43].mxu0 }
 0x2d1   : > { %v1347_v35 = vadd.f32 %v2143_v44, %v1346_v34 }
 0x2d2   : > { %1403 = vst.msk [vmem:[%s2150_s25 + $0xd8] sm:$0xff] %vm1375_vm3, %v1352_v33 }
 0x2d3   : > { %1402 = vst.msk [vmem:[%s2150_s25 + $0xd0] sm:$0xff] %vm1375_vm3, %v1347_v35  ;;  %v1826_v36 = vpop.f32.mrb[44].mxu0 }
 0x2d4   : > { %v1362_v37 = vadd.f32 %v1826_v36, %v2143_v44  ;;  %v1356_v38 = vpop.f32.mrb[45].mxu0 }
 0x2d5   : > { %v1357_v39 = vadd.f32 %v2143_v44, %v1356_v38 }
 0x2d6   : > { %1405 = vst.msk [vmem:[%s2150_s25 + $0xe8] sm:$0xff] %vm1375_vm3, %v1362_v37 }
 0x2d7   : > { %1404 = vst.msk [vmem:[%s2150_s25 + $0xe0] sm:$0xff] %vm1375_vm3, %v1357_v39  ;;  %v1829_v41 = vpop.f32.mrb[46].mxu0 }
 0x2d8   : > { %v1372_v42 = vadd.f32 %v1829_v41, %v2143_v44  ;;  %v1366_v43 = vpop.f32.mrb[47].mxu0 }
 0x2d9   : > { %v1367_v10 = vadd.f32 %v2143_v44, %v1366_v43 }
 0x2da   : > { %1407 = vst.msk [vmem:[%s2150_s25 + $0xf8] sm:$0xff] %vm1375_vm3, %v1372_v42 }
 0x2db   : > { %1406 = vst.msk [vmem:[%s2150_s25 + $0xf0] sm:$0xff] %vm1375_vm3, %v1367_v10 }
 0x2dc PF: > { %s19_s26 = sadd.s32 1, %s1854_s26  }
 0x2dd   : > { %p16_p4 = scmp.ge.s32.totalorder %s19_s26, 4  }
 0x2df   :  { %18 = sbr.rel (!%p16_p4) target bundleno = 3 (0x3), region = 78 }

</bundles_post_ra>
